<compile_context>
chip_gen: v6e
topology: v6e:2x2x1
jax: 0.10.0
libtpu: 0.0.40
codegen_flags: <defaults>
</compile_context>

<pallas_src>
import functools
from math import sqrt

import numpy as np
import jax
import jax.numpy as jnp
from jax.experimental import pallas as pl
from jax.experimental.pallas import tpu as pltpu

EPS = 1e-6
NEG_INF = -1e30  # finite stand-in for float('-inf'); exp() underflows to exactly 0


# ----------------------------- shared math helpers -----------------------------
def _rmsnorm(x, g):
    ms = jnp.mean(x * x, axis=-1, keepdims=True)
    return x * jax.lax.rsqrt(ms + EPS) * g


def _silu(z):  # exact sigmoid; used by the pure-JAX reference only
    return z * (1.0 / (1.0 + jnp.exp(-z)))


def _dot(a, b):
    return jnp.dot(a, b, preferred_element_type=jnp.float32)


def _dot_t(a, b):
    # a @ b.T (contract last dim of both) without materializing a transpose
    return jax.lax.dot_general(a, b, (((1,), (1,)), ((), ())),
                               preferred_element_type=jnp.float32)


def _vmem_limit_bytes():
    try:
        return int(pltpu.get_tpu_info().vmem_capacity_bytes * 0.85)
    except Exception:
        return 64 * 1024 * 1024


# ------------------------------ transformer kernel ------------------------------
def transformer_kernel(x0_ref, cos_ref, sin_ref,
                       g_attn_ref, wqkv_ref, wo_ref,
                       g_ffn_ref, wgh_ref, wd_ref,
                       x_out_ref,
                       x_scr, qr_scr, kr_scr, o_scr, mask_scr,
                       *, Bt, L, D, H, n_heads, d_head, n_layers, inv_scale):
    layer = pl.program_id(1)
    half = d_head // 2

    # one-time init for this batch tile: residual activation + causal mask scratch
    @pl.when(layer == 0)
    def _():
        x_scr[...] = x0_ref[...]
        rows = jax.lax.broadcasted_iota(jnp.int32, (L, L), 0)
        cols = jax.lax.broadcasted_iota(jnp.int32, (L, L), 1)
        mask_scr[...] = jnp.where(cols > rows, jnp.float32(NEG_INF), jnp.float32(0.0))

    x = x_scr[...]                 # (Bt*L, D) f32, resident across layers
    cos = cos_ref[...]             # (L, d_head/2) f32
    sin = sin_ref[...]
    mask = mask_scr[...]           # (L, L) f32

    # ---- attention: fused QKV projection ----
    xn = _rmsnorm(x, g_attn_ref[0])
    qkv = _dot(xn.astype(jnp.bfloat16), wqkv_ref[0])          # (Bt*L, 3D) f32
    q, k, v = qkv[:, :D], qkv[:, D:2 * D], qkv[:, 2 * D:]

    # RoPE (f32) -> per-head-contiguous bf16 scratch: head h occupies columns
    # [h*d_head : (h+1)*d_head] laid out [rotated-even | rotated-odd], so the
    # per-head score matmul below contracts over the FULL d_head in one pass.
    # NOTE: static Python loops are fine at small Bt/n_heads; for large B use
    # batch_tiles (grid axis) and/or lax.fori_loop to bound live ranges.
    for bb in range(Bt):
        r0, r1 = bb * L, (bb + 1) * L
        for h in range(n_heads):
            c0 = h * d_head
            q1, q2 = q[r0:r1, c0:c0 + half], q[r0:r1, c0 + half:c0 + d_head]
            k1, k2 = k[r0:r1, c0:c0 + half], k[r0:r1, c0 + half:c0 + d_head]
            qr_scr[r0:r1, c0:c0 + half]          = (q1 * cos - q2 * sin).astype(jnp.bfloat16)
            qr_scr[r0:r1, c0 + half:c0 + d_head] = (q1 * sin + q2 * cos).astype(jnp.bfloat16)
            kr_scr[r0:r1, c0:c0 + half]          = (k1 * cos - k2 * sin).astype(jnp.bfloat16)
            kr_scr[r0:r1, c0 + half:c0 + d_head] = (k1 * sin + k2 * cos).astype(jnp.bfloat16)

    # per-(batch, head) scores: one K=d_head matmul each; head output written
    # directly into the (Bt*L, D) o-scratch slice (no concatenations).
    for bb in range(Bt):
        r0, r1 = bb * L, (bb + 1) * L
        for h in range(n_heads):
            c0, c1 = h * d_head, (h + 1) * d_head
            s = _dot_t(qr_scr[r0:r1, c0:c1], kr_scr[r0:r1, c0:c1]) * inv_scale + mask
            s = s - jnp.max(s, axis=-1, keepdims=True)
            p = jnp.exp(s)
            p = p / jnp.sum(p, axis=-1, keepdims=True)        # exact denom (accuracy)
            o_scr[r0:r1, c0:c1] = jnp.dot(
                p.astype(jnp.bfloat16), v[r0:r1, c0:c1].astype(jnp.bfloat16),
                preferred_element_type=jnp.float32).astype(jnp.bfloat16)

    x = x + _dot(o_scr[...], wo_ref[0])                       # single full-K W_o matmul

    # ---- SwiGLU FFN with fused gate|hidden projection ----
    xn2 = _rmsnorm(x, g_ffn_ref[0])
    gh = _dot(xn2.astype(jnp.bfloat16), wgh_ref[0])           # (Bt*L, 2H)
    gate, hid = gh[:, :H], gh[:, H:]
    sig = 1.0 / (1.0 + jnp.exp(-gate))                        # exact sigmoid (EUP exp)
    x = x + _dot((gate * sig * hid).astype(jnp.bfloat16), wd_ref[0])
    x_scr[...] = x

    @pl.when(layer == n_layers - 1)
    def _():
        x_out_ref[...] = x


# ------------------------------ pallas_call wrapper -----------------------------
def agent_forward(params, patch, box, d_model, n_heads, batch_tiles=1):
    """Agent.forward(patch, box) -> (reward, label, box) with a fused Pallas
    transformer.  batch_tiles>1 adds a 'parallel' batch grid axis (v7x megacore)."""
    B, L, P = patch.shape
    D = d_model
    d_head = D // n_heads
    half = d_head // 2
    assert B % batch_tiles == 0
    Bt = B // batch_tiles
    BtL = Bt * L
    BL = B * L

    kp = prepare_kernel_params(params, d_model, n_heads)
    n_layers = kp["wqkv"].shape[0]
    H = kp["wd"].shape[1]

    # ---- embedding in plain XLA (f32 exact); kernel only sees x0 (BL, D) ----
    sinemb = box_sinusoid(box, D)
    x0 = (patch @ params["wp"] + params["bp"]
          + sinemb @ params["wb"] + params["bb"]).reshape(BL, D)

    cos, sin = rope_tables(L, d_head)                          # (L, d_head/2)

    kern = functools.partial(transformer_kernel, Bt=Bt, L=L, D=D, H=H,
                             n_heads=n_heads, d_head=d_head, n_layers=n_layers,
                             inv_scale=1.0 / sqrt(float(d_head)))

    def const_spec(shape):   # layer/tile-invariant block (tiny: cos/sin tables)
        return pl.BlockSpec(shape, lambda t, l: (0,) * len(shape))

    def layer_spec(shape):   # per-layer block from a stacked weight
        n = len(shape)
        return pl.BlockSpec((1,) + tuple(shape[1:]), lambda t, l: (l,) + (0,) * (n - 1))

    x_out = pl.pallas_call(
        kern,
        out_shape=jax.ShapeDtypeStruct((BL, D), jnp.float32),
        grid_spec=pltpu.PrefetchScalarGridSpec(
            num_scalar_prefetch=0,
            grid=(batch_tiles, n_layers),
            in_specs=[
                pl.BlockSpec((BtL, D), lambda t, l: (t, 0)),   # x0 per batch tile
                const_spec((L, half)), const_spec((L, half)),  # cos / sin
                layer_spec(kp["g_attn"].shape), layer_spec(kp["wqkv"].shape),
                layer_spec(kp["wo"].shape),
                layer_spec(kp["g_ffn"].shape), layer_spec(kp["wgh"].shape),
                layer_spec(kp["wd"].shape),
            ],
            out_specs=pl.BlockSpec((BtL, D), lambda t, l: (t, 0)),
            scratch_shapes=[
                pltpu.VMEM((BtL, D), jnp.float32),    # x residual (resident across layers)
                pltpu.VMEM((BtL, D), jnp.bfloat16),   # rotated q (per-head contiguous)
                pltpu.VMEM((BtL, D), jnp.bfloat16),   # rotated k
                pltpu.VMEM((BtL, D), jnp.bfloat16),   # per-head attention output
                pltpu.VMEM((L, L), jnp.float32),      # causal mask (built once)
            ],
        ),
        compiler_params=pltpu.CompilerParams(
            dimension_semantics=("parallel", "arbitrary"),
            vmem_limit_bytes=_vmem_limit_bytes(),
        ),
    )(x0, cos, sin, kp["g_attn"], kp["wqkv"], kp["wo"],
      kp["g_ffn"], kp["wgh"], kp["wd"])

    # ---- prediction heads in plain XLA (f32 exact) ----
    x = x_out.reshape(B, L, D)

    def head(p):
        return _rmsnorm(x, p["g"]) @ p["w"] + p["b"]

    return head(params["reward"]), head(params["label"]), head(params["box"])


# ------------------------------ host-side glue ----------------------------------
def box_sinusoid(box, d_model, num_items=4, base=10000.0):
    # StackedSinusoidalEmbedding: stack cos/sin interleaved per item, flatten to D
    d_stack = d_model // num_items
    theta = 1.0 / (base ** (2.0 * jnp.arange(d_stack // 2, dtype=jnp.float32) / d_stack))
    ang = box[..., None] * theta                              # (B, L, 4, d_stack//2)
    emb = jnp.stack([jnp.cos(ang), jnp.sin(ang)], axis=-1)    # (..., 2)
    return emb.reshape(box.shape[:-1] + (d_model,))


def rope_tables(L, d_head, base=10000.0):
    theta = 1.0 / (base ** (2.0 * jnp.arange(d_head // 2, dtype=jnp.float32) / d_head))
    ang = jnp.arange(L, dtype=jnp.float32)[:, None] * theta   # (L, d_head//2)
    return jnp.cos(ang), jnp.sin(ang)


def causal_mask(L):  # used by the pure-JAX reference only
    m = jnp.triu(jnp.ones((L, L), jnp.float32), 1)
    return jnp.where(m > 0, jnp.float32(NEG_INF), jnp.float32(0.0))


def init_params(key, in_channels, patch_size, num_labels, d_model, n_layers, n_heads):
    P = in_channels * patch_size * patch_size
    H = 4 * d_model
    keys = list(jax.random.split(key, 16 + 8 * n_layers))
    ki = iter(keys)

    def lin(fan_in, fan_out):
        bound = 1.0 / np.sqrt(fan_in)
        return jax.random.uniform(next(ki), (fan_in, fan_out), jnp.float32, -bound, bound)

    def bias(fan_in, fan_out):
        bound = 1.0 / np.sqrt(fan_in)
        return jax.random.uniform(next(ki), (1, fan_out), jnp.float32, -bound, bound)

    params = {
        "wp": lin(P, d_model), "bp": bias(P, d_model),
        "wb": lin(d_model, d_model), "bb": bias(d_model, d_model),
        "layers": [],
        "reward": {"g": jnp.ones((1, d_model), jnp.float32), "w": lin(d_model, 2), "b": bias(d_model, 2)},
        "label": {"g": jnp.ones((1, d_model), jnp.float32), "w": lin(d_model, num_labels), "b": bias(d_model, num_labels)},
        "box": {"g": jnp.ones((1, d_model), jnp.float32), "w": lin(d_model, 4), "b": bias(d_model, 4)},
    }
    for _ in range(n_layers):
        params["layers"].append({
            "wq": lin(d_model, d_model), "wk": lin(d_model, d_model),
            "wv": lin(d_model, d_model), "wo": lin(d_model, d_model),
            "wg": lin(d_model, H), "wh": lin(d_model, H), "wd": lin(H, d_model),
            "g_attn": jnp.ones((1, d_model), jnp.float32),
            "g_ffn": jnp.ones((1, d_model), jnp.float32),
        })
    return params


def prepare_kernel_params(params, d_model, n_heads):
    """Fuse / permute / stack / bf16-cast the per-layer weights for the kernel.

    W_q/W_k columns are permuted so each head's block is [even comps | odd comps]
    (de-interleaved WITHIN the head).  The kernel's RoPE + per-head-contiguous
    rotated-q/k scratch layout relies on exactly this ordering together with the
    (L, d_head/2) cos/sin tables — change both sides together.
    """
    D = d_model
    d_head = D // n_heads
    bf = jnp.bfloat16
    perm = np.concatenate([
        np.concatenate([np.arange(h * d_head, (h + 1) * d_head, 2),
                        np.arange(h * d_head + 1, (h + 1) * d_head, 2)])
        for h in range(n_heads)])

    layers = params["layers"]
    wqkv = jnp.stack([jnp.concatenate([l["wq"][:, perm], l["wk"][:, perm], l["wv"]],
                                      axis=1) for l in layers]).astype(bf)
    wo = jnp.stack([l["wo"] for l in layers]).astype(bf)
    wgh = jnp.stack([jnp.concatenate([l["wg"], l["wh"]], axis=1) for l in layers]).astype(bf)
    wd = jnp.stack([l["wd"] for l in layers]).astype(bf)
    g_attn = jnp.stack([l["g_attn"] for l in layers])
    g_ffn = jnp.stack([l["g_ffn"] for l in layers])
    # TODO(synk): optional int8 (v5e/v6e) / fp8 (v7x) weight quantization with
    # per-tensor scales would halve weight DMA; gated behind an accuracy check.
    return {"wqkv": wqkv, "wo": wo, "wgh": wgh, "wd": wd,
            "g_attn": g_attn, "g_ffn": g_ffn}


# --------------------------- pure-JAX reference (torch semantics) ----------------
def ref_forward(params, patch, box, d_model, n_heads):
    B, L, _ = patch.shape
    d_head = d_model // n_heads
    x = (patch @ params["wp"] + params["bp"]
         + box_sinusoid(box, d_model) @ params["wb"] + params["bb"])
    cos, sin = rope_tables(L, d_head)
    mask = causal_mask(L)
    scale = sqrt(float(d_head))

    def rope(t):  # interleaved complex rotation, exactly as torch view_as_complex
        tr, ti = t[..., 0::2], t[..., 1::2]
        return jnp.stack([tr * cos - ti * sin, tr * sin + ti * cos], axis=-1).reshape(t.shape)

    for layer in params["layers"]:
        xn = _rmsnorm(x, layer["g_attn"])
        q = (xn @ layer["wq"]).reshape(B, L, n_heads, d_head).transpose(0, 2, 1, 3)
        k = (xn @ layer["wk"]).reshape(B, L, n_heads, d_head).transpose(0, 2, 1, 3)
        v = (xn @ layer["wv"]).reshape(B, L, n_heads, d_head).transpose(0, 2, 1, 3)
        s = jnp.einsum("bnld,bnmd->bnlm", rope(q), rope(k)) / scale + mask
        a = jax.nn.softmax(s, axis=-1)
        o = jnp.einsum("bnlm,bnmd->bnld", a, v).transpose(0, 2, 1, 3).reshape(B, L, d_model)
        x = x + o @ layer["wo"]
        xn2 = _rmsnorm(x, layer["g_ffn"])
        x = x + (_silu(xn2 @ layer["wg"]) * (xn2 @ layer["wh"])) @ layer["wd"]

    def head(p):
        return _rmsnorm(x, p["g"]) @ p["w"] + p["b"]

    return head(params["reward"]), head(params["label"]), head(params["box"])


# ------------------------------------ main ---------------------------------------
if __name__ == "__main__":
    # TODO(synk): Agent.random_history (data-dependent Python while-loop rollout)
    # is host-side control flow, not part of forward(); it is not implemented.
    in_channels, patch_size, num_labels = 4, 4, 8
    d_model, n_layers, n_heads, max_length = 32, 2, 2, 8
    B, L = 2, 8
    P = in_channels * patch_size * patch_size

    key = jax.random.PRNGKey(0)
    k_params, kx, kb = jax.random.split(key, 3)
    params = init_params(k_params, in_channels, patch_size, num_labels, d_model, n_layers, n_heads)
    patch = jax.random.normal(kx, (B, L, P), jnp.float32)
    box = jax.random.uniform(kb, (B, L, 4), jnp.float32)

    # batch_tiles=2 exercises the ('parallel' batch-tile, 'arbitrary' layer) grid
    # (splits the batch across TensorCores on v7x; sequential and harmless on v5e/v6e).
    reward, label, boxp = agent_forward(params, patch, box, d_model, n_heads, batch_tiles=2)
    reward, label, boxp = jax.block_until_ready((reward, label, boxp))

    # f32 reference with exact torch semantics; kernel uses bf16 matmuls inside
    # the transformer body, so tolerance is loosened accordingly.
    r_ref, l_ref, b_ref = ref_forward(params, patch, box, d_model, n_heads)
    np.testing.assert_allclose(np.asarray(reward), np.asarray(r_ref), rtol=5e-2, atol=5e-2)
    np.testing.assert_allclose(np.asarray(label), np.asarray(l_ref), rtol=5e-2, atol=5e-2)
    np.testing.assert_allclose(np.asarray(boxp), np.asarray(b_ref), rtol=5e-2, atol=5e-2)

    print("KERNEL_OK")
</pallas_src>

<mosaic_0001>
module attributes {stable_mosaic.version = 11 : i64} {
  func.func @transformer_kernel(%arg0: i32, %arg1: i32, %arg2: memref<8x32xf32, #tpu.memory_space<vmem>>, %arg3: memref<8x8xf32, #tpu.memory_space<vmem>>, %arg4: memref<8x8xf32, #tpu.memory_space<vmem>>, %arg5: memref<1x1x32xf32, #tpu.memory_space<vmem>>, %arg6: memref<1x32x96xbf16, #tpu.memory_space<vmem>>, %arg7: memref<1x32x32xbf16, #tpu.memory_space<vmem>>, %arg8: memref<1x1x32xf32, #tpu.memory_space<vmem>>, %arg9: memref<1x32x256xbf16, #tpu.memory_space<vmem>>, %arg10: memref<1x128x32xbf16, #tpu.memory_space<vmem>>, %arg11: memref<8x32xf32, #tpu.memory_space<vmem>>, %arg12: memref<8x32xf32, #tpu.memory_space<vmem>>, %arg13: memref<8x32xbf16, #tpu.memory_space<vmem>>, %arg14: memref<8x32xbf16, #tpu.memory_space<vmem>>, %arg15: memref<8x32xbf16, #tpu.memory_space<vmem>>, %arg16: memref<8x8xf32, #tpu.memory_space<vmem>>) attributes {dimension_semantics = [#tpu.dimension_semantics<parallel>, #tpu.dimension_semantics<arbitrary>], iteration_bounds = array<i64: 2, 2>, scalar_prefetch = 0 : i64, scratch_operands = 5 : i64, tpu.core_type = #tpu.core_type<tc>, window_params = [{transform_indices = @transform_0, window_bounds = array<i64: 8, 32>}, {pipeline_mode = #tpu.pipeline_mode<synchronous>, transform_indices = @transform_1, window_bounds = array<i64: 8, 8>}, {pipeline_mode = #tpu.pipeline_mode<synchronous>, transform_indices = @transform_2, window_bounds = array<i64: 8, 8>}, {transform_indices = @transform_3, window_bounds = array<i64: 1, 1, 32>}, {transform_indices = @transform_4, window_bounds = array<i64: 1, 32, 96>}, {transform_indices = @transform_5, window_bounds = array<i64: 1, 32, 32>}, {transform_indices = @transform_6, window_bounds = array<i64: 1, 1, 32>}, {transform_indices = @transform_7, window_bounds = array<i64: 1, 32, 256>}, {transform_indices = @transform_8, window_bounds = array<i64: 1, 128, 32>}, {transform_indices = @transform_9, window_bounds = array<i64: 8, 32>}]} {
    %c0_i32 = arith.constant 0 : i32
    %0 = arith.cmpi eq, %arg1, %c0_i32 : i32
    %1 = arith.extui %0 : i1 to i32
    %c0_i32_0 = arith.constant 0 : i32
    %2 = arith.cmpi ne, %1, %c0_i32_0 : i32
    scf.if %2 {
      %c0_78 = arith.constant 0 : index
      %c0_79 = arith.constant 0 : index
      %161 = vector.load %arg2[%c0_78, %c0_79] : memref<8x32xf32, #tpu.memory_space<vmem>>, vector<8x32xf32>
      %c0_80 = arith.constant 0 : index
      %c0_81 = arith.constant 0 : index
      %162 = vector.load %arg12[%c0_80, %c0_81] : memref<8x32xf32, #tpu.memory_space<vmem>>, vector<8x32xf32>
      tpu.vector_store %arg12[%c0_80, %c0_81], %161 {strides = array<i32>} : memref<8x32xf32, #tpu.memory_space<vmem>>, vector<8x32xf32>,
      %163 = tpu.iota {dimensions = array<i32: 0>} : vector<8x8xi32>
      %164 = tpu.iota {dimensions = array<i32: 1>} : vector<8x8xi32>
      %165 = arith.cmpi sgt, %164, %163 : vector<8x8xi32>
      %cst_82 = arith.constant -1.000000e+30 : f32
      %cst_83 = arith.constant 0.000000e+00 : f32
      %166 = vector.broadcast %cst_82 : f32 to vector<8x8xf32>
      %167 = vector.broadcast %cst_83 : f32 to vector<8x8xf32>
      %168 = arith.select %165, %166, %167 : vector<8x8xi1>, vector<8x8xf32>
      %c0_84 = arith.constant 0 : index
      %c0_85 = arith.constant 0 : index
      %169 = vector.load %arg16[%c0_84, %c0_85] : memref<8x8xf32, #tpu.memory_space<vmem>>, vector<8x8xf32>
      tpu.vector_store %arg16[%c0_84, %c0_85], %168 {strides = array<i32>} : memref<8x8xf32, #tpu.memory_space<vmem>>, vector<8x8xf32>,
    } else {
    }
    %c0 = arith.constant 0 : index
    %c0_1 = arith.constant 0 : index
    %3 = vector.load %arg12[%c0, %c0_1] : memref<8x32xf32, #tpu.memory_space<vmem>>, vector<8x32xf32>
    %c0_2 = arith.constant 0 : index
    %c0_3 = arith.constant 0 : index
    %4 = vector.load %arg3[%c0_2, %c0_3] : memref<8x8xf32, #tpu.memory_space<vmem>>, vector<8x8xf32>
    %c0_4 = arith.constant 0 : index
    %c0_5 = arith.constant 0 : index
    %5 = vector.load %arg4[%c0_4, %c0_5] : memref<8x8xf32, #tpu.memory_space<vmem>>, vector<8x8xf32>
    %c0_6 = arith.constant 0 : index
    %c0_7 = arith.constant 0 : index
    %6 = vector.load %arg16[%c0_6, %c0_7] : memref<8x8xf32, #tpu.memory_space<vmem>>, vector<8x8xf32>
    %c0_8 = arith.constant 0 : index
    %c0_9 = arith.constant 0 : index
    %c0_10 = arith.constant 0 : index
    %7 = vector.load %arg5[%c0_8, %c0_9, %c0_10] : memref<1x1x32xf32, #tpu.memory_space<vmem>>, vector<1x1x32xf32>
    %8 = vector.shape_cast %7 : vector<1x1x32xf32> to vector<1x32xf32>
    %9 = arith.mulf %3, %3 : vector<8x32xf32>
    %cst = arith.constant dense<0.000000e+00> : vector<8xf32>
    %10 = vector.multi_reduction <add>, %9, %cst [1] : vector<8x32xf32> to vector<8xf32>
    %11 = vector.shape_cast %10 : vector<8xf32> to vector<8x1xf32>
    %cst_11 = arith.constant 3.200000e+01 : f32
    %12 = vector.broadcast %cst_11 : f32 to vector<8x1xf32>
    %13 = arith.divf %11, %12 : vector<8x1xf32>
    %cst_12 = arith.constant 9.99999997E-7 : f32
    %14 = vector.broadcast %cst_12 : f32 to vector<8x1xf32>
    %15 = arith.addf %13, %14 : vector<8x1xf32>
    %16 = math.rsqrt %15 : vector<8x1xf32>
    %17 = vector.broadcast %16 : vector<8x1xf32> to vector<8x32xf32>
    %18 = arith.mulf %3, %17 : vector<8x32xf32>
    %19 = vector.broadcast %8 : vector<1x32xf32> to vector<8x32xf32>
    %20 = arith.mulf %18, %19 : vector<8x32xf32>
    %21 = arith.truncf %20 : vector<8x32xf32> to vector<8x32xbf16>
    %c0_13 = arith.constant 0 : index
    %c0_14 = arith.constant 0 : index
    %c0_15 = arith.constant 0 : index
    %22 = vector.load %arg6[%c0_13, %c0_14, %c0_15] : memref<1x32x96xbf16, #tpu.memory_space<vmem>>, vector<1x32x96xbf16>
    %23 = vector.shape_cast %22 : vector<1x32x96xbf16> to vector<32x96xbf16>
    %cst_16 = arith.constant dense<0.000000e+00> : vector<8x96xf32>
    %24 = tpu.matmul %21, %23, %cst_16 {dimension_numbers = #tpu.dot_dimension_numbers<[1], [0], [0], [1], [0, 0, 1, 1], [], []>} : vector<8x32xbf16>, vector<32x96xbf16>, vector<8x96xf32> -> vector<8x96xf32>
    %25 = vector.extract_strided_slice %24 {offsets = [0, 0], sizes = [8, 32], strides = [1, 1]} : vector<8x96xf32> to vector<8x32xf32>
    %26 = vector.extract_strided_slice %24 {offsets = [0, 32], sizes = [8, 32], strides = [1, 1]} : vector<8x96xf32> to vector<8x32xf32>
    %27 = vector.extract_strided_slice %24 {offsets = [0, 64], sizes = [8, 32], strides = [1, 1]} : vector<8x96xf32> to vector<8x32xf32>
    %28 = vector.extract_strided_slice %25 {offsets = [0, 0], sizes = [8, 8], strides = [1, 1]} : vector<8x32xf32> to vector<8x8xf32>
    %29 = vector.extract_strided_slice %25 {offsets = [0, 8], sizes = [8, 8], strides = [1, 1]} : vector<8x32xf32> to vector<8x8xf32>
    %30 = vector.extract_strided_slice %26 {offsets = [0, 0], sizes = [8, 8], strides = [1, 1]} : vector<8x32xf32> to vector<8x8xf32>
    %31 = vector.extract_strided_slice %26 {offsets = [0, 8], sizes = [8, 8], strides = [1, 1]} : vector<8x32xf32> to vector<8x8xf32>
    %32 = arith.mulf %28, %4 : vector<8x8xf32>
    %33 = arith.mulf %29, %5 : vector<8x8xf32>
    %34 = arith.subf %32, %33 : vector<8x8xf32>
    %35 = arith.truncf %34 : vector<8x8xf32> to vector<8x8xbf16>
    %c0_17 = arith.constant 0 : index
    %c0_18 = arith.constant 0 : index
    %36 = vector.load %arg13[%c0_17, %c0_18] : memref<8x32xbf16, #tpu.memory_space<vmem>>, vector<8x8xbf16>
    tpu.vector_store %arg13[%c0_17, %c0_18], %35 {strides = array<i32>} : memref<8x32xbf16, #tpu.memory_space<vmem>>, vector<8x8xbf16>,
    %37 = arith.mulf %28, %5 : vector<8x8xf32>
    %38 = arith.mulf %29, %4 : vector<8x8xf32>
    %39 = arith.addf %37, %38 : vector<8x8xf32>
    %40 = arith.truncf %39 : vector<8x8xf32> to vector<8x8xbf16>
    %c0_19 = arith.constant 0 : index
    %c8 = arith.constant 8 : index
    %41 = vector.load %arg13[%c0_19, %c8] : memref<8x32xbf16, #tpu.memory_space<vmem>>, vector<8x8xbf16>
    tpu.vector_store %arg13[%c0_19, %c8], %40 {strides = array<i32>} : memref<8x32xbf16, #tpu.memory_space<vmem>>, vector<8x8xbf16>,
    %42 = arith.mulf %30, %4 : vector<8x8xf32>
    %43 = arith.mulf %31, %5 : vector<8x8xf32>
    %44 = arith.subf %42, %43 : vector<8x8xf32>
    %45 = arith.truncf %44 : vector<8x8xf32> to vector<8x8xbf16>
    %c0_20 = arith.constant 0 : index
    %c0_21 = arith.constant 0 : index
    %46 = vector.load %arg14[%c0_20, %c0_21] : memref<8x32xbf16, #tpu.memory_space<vmem>>, vector<8x8xbf16>
    tpu.vector_store %arg14[%c0_20, %c0_21], %45 {strides = array<i32>} : memref<8x32xbf16, #tpu.memory_space<vmem>>, vector<8x8xbf16>,
    %47 = arith.mulf %30, %5 : vector<8x8xf32>
    %48 = arith.mulf %31, %4 : vector<8x8xf32>
    %49 = arith.addf %47, %48 : vector<8x8xf32>
    %50 = arith.truncf %49 : vector<8x8xf32> to vector<8x8xbf16>
    %c0_22 = arith.constant 0 : index
    %c8_23 = arith.constant 8 : index
    %51 = vector.load %arg14[%c0_22, %c8_23] : memref<8x32xbf16, #tpu.memory_space<vmem>>, vector<8x8xbf16>
    tpu.vector_store %arg14[%c0_22, %c8_23], %50 {strides = array<i32>} : memref<8x32xbf16, #tpu.memory_space<vmem>>, vector<8x8xbf16>,
    %52 = vector.extract_strided_slice %25 {offsets = [0, 16], sizes = [8, 8], strides = [1, 1]} : vector<8x32xf32> to vector<8x8xf32>
    %53 = vector.extract_strided_slice %25 {offsets = [0, 24], sizes = [8, 8], strides = [1, 1]} : vector<8x32xf32> to vector<8x8xf32>
    %54 = vector.extract_strided_slice %26 {offsets = [0, 16], sizes = [8, 8], strides = [1, 1]} : vector<8x32xf32> to vector<8x8xf32>
    %55 = vector.extract_strided_slice %26 {offsets = [0, 24], sizes = [8, 8], strides = [1, 1]} : vector<8x32xf32> to vector<8x8xf32>
    %56 = arith.mulf %52, %4 : vector<8x8xf32>
    %57 = arith.mulf %53, %5 : vector<8x8xf32>
    %58 = arith.subf %56, %57 : vector<8x8xf32>
    %59 = arith.truncf %58 : vector<8x8xf32> to vector<8x8xbf16>
    %c0_24 = arith.constant 0 : index
    %c16 = arith.constant 16 : index
    %60 = vector.load %arg13[%c0_24, %c16] : memref<8x32xbf16, #tpu.memory_space<vmem>>, vector<8x8xbf16>
    tpu.vector_store %arg13[%c0_24, %c16], %59 {strides = array<i32>} : memref<8x32xbf16, #tpu.memory_space<vmem>>, vector<8x8xbf16>,
    %61 = arith.mulf %52, %5 : vector<8x8xf32>
    %62 = arith.mulf %53, %4 : vector<8x8xf32>
    %63 = arith.addf %61, %62 : vector<8x8xf32>
    %64 = arith.truncf %63 : vector<8x8xf32> to vector<8x8xbf16>
    %c0_25 = arith.constant 0 : index
    %c24 = arith.constant 24 : index
    %65 = vector.load %arg13[%c0_25, %c24] : memref<8x32xbf16, #tpu.memory_space<vmem>>, vector<8x8xbf16>
    tpu.vector_store %arg13[%c0_25, %c24], %64 {strides = array<i32>} : memref<8x32xbf16, #tpu.memory_space<vmem>>, vector<8x8xbf16>,
    %66 = arith.mulf %54, %4 : vector<8x8xf32>
    %67 = arith.mulf %55, %5 : vector<8x8xf32>
    %68 = arith.subf %66, %67 : vector<8x8xf32>
    %69 = arith.truncf %68 : vector<8x8xf32> to vector<8x8xbf16>
    %c0_26 = arith.constant 0 : index
    %c16_27 = arith.constant 16 : index
    %70 = vector.load %arg14[%c0_26, %c16_27] : memref<8x32xbf16, #tpu.memory_space<vmem>>, vector<8x8xbf16>
    tpu.vector_store %arg14[%c0_26, %c16_27], %69 {strides = array<i32>} : memref<8x32xbf16, #tpu.memory_space<vmem>>, vector<8x8xbf16>,
    %71 = arith.mulf %54, %5 : vector<8x8xf32>
    %72 = arith.mulf %55, %4 : vector<8x8xf32>
    %73 = arith.addf %71, %72 : vector<8x8xf32>
    %74 = arith.truncf %73 : vector<8x8xf32> to vector<8x8xbf16>
    %c0_28 = arith.constant 0 : index
    %c24_29 = arith.constant 24 : index
    %75 = vector.load %arg14[%c0_28, %c24_29] : memref<8x32xbf16, #tpu.memory_space<vmem>>, vector<8x8xbf16>
    tpu.vector_store %arg14[%c0_28, %c24_29], %74 {strides = array<i32>} : memref<8x32xbf16, #tpu.memory_space<vmem>>, vector<8x8xbf16>,
    %c0_30 = arith.constant 0 : index
    %c0_31 = arith.constant 0 : index
    %76 = vector.load %arg13[%c0_30, %c0_31] : memref<8x32xbf16, #tpu.memory_space<vmem>>, vector<8x16xbf16>
    %c0_32 = arith.constant 0 : index
    %c0_33 = arith.constant 0 : index
    %77 = vector.load %arg14[%c0_32, %c0_33] : memref<8x32xbf16, #tpu.memory_space<vmem>>, vector<8x16xbf16>
    %cst_34 = arith.constant dense<0.000000e+00> : vector<8x8xf32>
    %78 = tpu.matmul %76, %77, %cst_34 {dimension_numbers = #tpu.dot_dimension_numbers<[1], [1], [0], [0], [0, 0, 1, 0], [], []>} : vector<8x16xbf16>, vector<8x16xbf16>, vector<8x8xf32> -> vector<8x8xf32>
    %cst_35 = arith.constant 2.500000e-01 : f32
    %79 = vector.broadcast %cst_35 : f32 to vector<8x8xf32>
    %80 = arith.mulf %78, %79 : vector<8x8xf32>
    %81 = arith.addf %80, %6 : vector<8x8xf32>
    %cst_36 = arith.constant dense<0xFF800000> : vector<8xf32>
    %82 = vector.multi_reduction <maximumf>, %81, %cst_36 [1] : vector<8x8xf32> to vector<8xf32>
    %83 = vector.shape_cast %82 : vector<8xf32> to vector<8x1xf32>
    %84 = vector.broadcast %83 : vector<8x1xf32> to vector<8x8xf32>
    %85 = arith.subf %81, %84 : vector<8x8xf32>
    %86 = math.exp %85 : vector<8x8xf32>
    %cst_37 = arith.constant dense<0.000000e+00> : vector<8xf32>
    %87 = vector.multi_reduction <add>, %86, %cst_37 [1] : vector<8x8xf32> to vector<8xf32>
    %88 = vector.shape_cast %87 : vector<8xf32> to vector<8x1xf32>
    %89 = vector.broadcast %88 : vector<8x1xf32> to vector<8x8xf32>
    %90 = arith.divf %86, %89 : vector<8x8xf32>
    %91 = arith.truncf %90 : vector<8x8xf32> to vector<8x8xbf16>
    %92 = vector.extract_strided_slice %27 {offsets = [0, 0], sizes = [8, 16], strides = [1, 1]} : vector<8x32xf32> to vector<8x16xf32>
    %93 = arith.truncf %92 : vector<8x16xf32> to vector<8x16xbf16>
    %cst_38 = arith.constant dense<0.000000e+00> : vector<8x16xf32>
    %94 = tpu.matmul %91, %93, %cst_38 {dimension_numbers = #tpu.dot_dimension_numbers<[1], [0], [0], [1], [0, 0, 1, 1], [], []>} : vector<8x8xbf16>, vector<8x16xbf16>, vector<8x16xf32> -> vector<8x16xf32>
    %95 = arith.truncf %94 : vector<8x16xf32> to vector<8x16xbf16>
    %c0_39 = arith.constant 0 : index
    %c0_40 = arith.constant 0 : index
    %96 = vector.load %arg15[%c0_39, %c0_40] : memref<8x32xbf16, #tpu.memory_space<vmem>>, vector<8x16xbf16>
    tpu.vector_store %arg15[%c0_39, %c0_40], %95 {strides = array<i32>} : memref<8x32xbf16, #tpu.memory_space<vmem>>, vector<8x16xbf16>,
    %c0_41 = arith.constant 0 : index
    %c16_42 = arith.constant 16 : index
    %97 = vector.load %arg13[%c0_41, %c16_42] : memref<8x32xbf16, #tpu.memory_space<vmem>>, vector<8x16xbf16>
    %c0_43 = arith.constant 0 : index
    %c16_44 = arith.constant 16 : index
    %98 = vector.load %arg14[%c0_43, %c16_44] : memref<8x32xbf16, #tpu.memory_space<vmem>>, vector<8x16xbf16>
    %cst_45 = arith.constant dense<0.000000e+00> : vector<8x8xf32>
    %99 = tpu.matmul %97, %98, %cst_45 {dimension_numbers = #tpu.dot_dimension_numbers<[1], [1], [0], [0], [0, 0, 1, 0], [], []>} : vector<8x16xbf16>, vector<8x16xbf16>, vector<8x8xf32> -> vector<8x8xf32>
    %cst_46 = arith.constant 2.500000e-01 : f32
    %100 = vector.broadcast %cst_46 : f32 to vector<8x8xf32>
    %101 = arith.mulf %99, %100 : vector<8x8xf32>
    %102 = arith.addf %101, %6 : vector<8x8xf32>
    %cst_47 = arith.constant dense<0xFF800000> : vector<8xf32>
    %103 = vector.multi_reduction <maximumf>, %102, %cst_47 [1] : vector<8x8xf32> to vector<8xf32>
    %104 = vector.shape_cast %103 : vector<8xf32> to vector<8x1xf32>
    %105 = vector.broadcast %104 : vector<8x1xf32> to vector<8x8xf32>
    %106 = arith.subf %102, %105 : vector<8x8xf32>
    %107 = math.exp %106 : vector<8x8xf32>
    %cst_48 = arith.constant dense<0.000000e+00> : vector<8xf32>
    %108 = vector.multi_reduction <add>, %107, %cst_48 [1] : vector<8x8xf32> to vector<8xf32>
    %109 = vector.shape_cast %108 : vector<8xf32> to vector<8x1xf32>
    %110 = vector.broadcast %109 : vector<8x1xf32> to vector<8x8xf32>
    %111 = arith.divf %107, %110 : vector<8x8xf32>
    %112 = arith.truncf %111 : vector<8x8xf32> to vector<8x8xbf16>
    %113 = vector.extract_strided_slice %27 {offsets = [0, 16], sizes = [8, 16], strides = [1, 1]} : vector<8x32xf32> to vector<8x16xf32>
    %114 = arith.truncf %113 : vector<8x16xf32> to vector<8x16xbf16>
    %cst_49 = arith.constant dense<0.000000e+00> : vector<8x16xf32>
    %115 = tpu.matmul %112, %114, %cst_49 {dimension_numbers = #tpu.dot_dimension_numbers<[1], [0], [0], [1], [0, 0, 1, 1], [], []>} : vector<8x8xbf16>, vector<8x16xbf16>, vector<8x16xf32> -> vector<8x16xf32>
    %116 = arith.truncf %115 : vector<8x16xf32> to vector<8x16xbf16>
    %c0_50 = arith.constant 0 : index
    %c16_51 = arith.constant 16 : index
    %117 = vector.load %arg15[%c0_50, %c16_51] : memref<8x32xbf16, #tpu.memory_space<vmem>>, vector<8x16xbf16>
    tpu.vector_store %arg15[%c0_50, %c16_51], %116 {strides = array<i32>} : memref<8x32xbf16, #tpu.memory_space<vmem>>, vector<8x16xbf16>,
    %c0_52 = arith.constant 0 : index
    %c0_53 = arith.constant 0 : index
    %118 = vector.load %arg15[%c0_52, %c0_53] : memref<8x32xbf16, #tpu.memory_space<vmem>>, vector<8x32xbf16>
    %c0_54 = arith.constant 0 : index
    %c0_55 = arith.constant 0 : index
    %c0_56 = arith.constant 0 : index
    %119 = vector.load %arg7[%c0_54, %c0_55, %c0_56] : memref<1x32x32xbf16, #tpu.memory_space<vmem>>, vector<1x32x32xbf16>
    %120 = vector.shape_cast %119 : vector<1x32x32xbf16> to vector<32x32xbf16>
    %cst_57 = arith.constant dense<0.000000e+00> : vector<8x32xf32>
    %121 = tpu.matmul %118, %120, %cst_57 {dimension_numbers = #tpu.dot_dimension_numbers<[1], [0], [0], [1], [0, 0, 1, 1], [], []>} : vector<8x32xbf16>, vector<32x32xbf16>, vector<8x32xf32> -> vector<8x32xf32>
    %122 = arith.addf %3, %121 : vector<8x32xf32>
    %c0_58 = arith.constant 0 : index
    %c0_59 = arith.constant 0 : index
    %c0_60 = arith.constant 0 : index
    %123 = vector.load %arg8[%c0_58, %c0_59, %c0_60] : memref<1x1x32xf32, #tpu.memory_space<vmem>>, vector<1x1x32xf32>
    %124 = vector.shape_cast %123 : vector<1x1x32xf32> to vector<1x32xf32>
    %125 = arith.mulf %122, %122 : vector<8x32xf32>
    %cst_61 = arith.constant dense<0.000000e+00> : vector<8xf32>
    %126 = vector.multi_reduction <add>, %125, %cst_61 [1] : vector<8x32xf32> to vector<8xf32>
    %127 = vector.shape_cast %126 : vector<8xf32> to vector<8x1xf32>
    %cst_62 = arith.constant 3.200000e+01 : f32
    %128 = vector.broadcast %cst_62 : f32 to vector<8x1xf32>
    %129 = arith.divf %127, %128 : vector<8x1xf32>
    %cst_63 = arith.constant 9.99999997E-7 : f32
    %130 = vector.broadcast %cst_63 : f32 to vector<8x1xf32>
    %131 = arith.addf %129, %130 : vector<8x1xf32>
    %132 = math.rsqrt %131 : vector<8x1xf32>
    %133 = vector.broadcast %132 : vector<8x1xf32> to vector<8x32xf32>
    %134 = arith.mulf %122, %133 : vector<8x32xf32>
    %135 = vector.broadcast %124 : vector<1x32xf32> to vector<8x32xf32>
    %136 = arith.mulf %134, %135 : vector<8x32xf32>
    %137 = arith.truncf %136 : vector<8x32xf32> to vector<8x32xbf16>
    %c0_64 = arith.constant 0 : index
    %c0_65 = arith.constant 0 : index
    %c0_66 = arith.constant 0 : index
    %138 = vector.load %arg9[%c0_64, %c0_65, %c0_66] : memref<1x32x256xbf16, #tpu.memory_space<vmem>>, vector<1x32x256xbf16>
    %139 = vector.shape_cast %138 : vector<1x32x256xbf16> to vector<32x256xbf16>
    %cst_67 = arith.constant dense<0.000000e+00> : vector<8x256xf32>
    %140 = tpu.matmul %137, %139, %cst_67 {dimension_numbers = #tpu.dot_dimension_numbers<[1], [0], [0], [1], [0, 0, 1, 1], [], []>} : vector<8x32xbf16>, vector<32x256xbf16>, vector<8x256xf32> -> vector<8x256xf32>
    %141 = vector.extract_strided_slice %140 {offsets = [0, 0], sizes = [8, 128], strides = [1, 1]} : vector<8x256xf32> to vector<8x128xf32>
    %142 = vector.extract_strided_slice %140 {offsets = [0, 128], sizes = [8, 128], strides = [1, 1]} : vector<8x256xf32> to vector<8x128xf32>
    %cst_68 = arith.constant 0.000000e+00 : f32
    %143 = vector.broadcast %cst_68 : f32 to vector<8x128xf32>
    %144 = arith.subf %143, %141 : vector<8x128xf32>
    %145 = math.exp %144 : vector<8x128xf32>
    %cst_69 = arith.constant 1.000000e+00 : f32
    %146 = vector.broadcast %cst_69 : f32 to vector<8x128xf32>
    %147 = arith.addf %146, %145 : vector<8x128xf32>
    %cst_70 = arith.constant 1.000000e+00 : f32
    %148 = vector.broadcast %cst_70 : f32 to vector<8x128xf32>
    %149 = arith.divf %148, %147 : vector<8x128xf32>
    %150 = arith.mulf %141, %149 : vector<8x128xf32>
    %151 = arith.mulf %150, %142 : vector<8x128xf32>
    %152 = arith.truncf %151 : vector<8x128xf32> to vector<8x128xbf16>
    %c0_71 = arith.constant 0 : index
    %c0_72 = arith.constant 0 : index
    %c0_73 = arith.constant 0 : index
    %153 = vector.load %arg10[%c0_71, %c0_72, %c0_73] : memref<1x128x32xbf16, #tpu.memory_space<vmem>>, vector<1x128x32xbf16>
    %154 = vector.shape_cast %153 : vector<1x128x32xbf16> to vector<128x32xbf16>
    %cst_74 = arith.constant dense<0.000000e+00> : vector<8x32xf32>
    %155 = tpu.matmul %152, %154, %cst_74 {dimension_numbers = #tpu.dot_dimension_numbers<[1], [0], [0], [1], [0, 0, 1, 1], [], []>} : vector<8x128xbf16>, vector<128x32xbf16>, vector<8x32xf32> -> vector<8x32xf32>
    %156 = arith.addf %122, %155 : vector<8x32xf32>
    %c0_75 = arith.constant 0 : index
    %c0_76 = arith.constant 0 : index
    %157 = vector.load %arg12[%c0_75, %c0_76] : memref<8x32xf32, #tpu.memory_space<vmem>>, vector<8x32xf32>
    tpu.vector_store %arg12[%c0_75, %c0_76], %156 {strides = array<i32>} : memref<8x32xf32, #tpu.memory_space<vmem>>, vector<8x32xf32>,
    %c1_i32 = arith.constant 1 : i32
    %158 = arith.cmpi eq, %arg1, %c1_i32 : i32
    %159 = arith.extui %158 : i1 to i32
    %c0_i32_77 = arith.constant 0 : i32
    %160 = arith.cmpi ne, %159, %c0_i32_77 : i32
    scf.if %160 {
      %c0_78 = arith.constant 0 : index
      %c0_79 = arith.constant 0 : index
      %161 = vector.load %arg11[%c0_78, %c0_79] : memref<8x32xf32, #tpu.memory_space<vmem>>, vector<8x32xf32>
      tpu.vector_store %arg11[%c0_78, %c0_79], %156 {strides = array<i32>} : memref<8x32xf32, #tpu.memory_space<vmem>>, vector<8x32xf32>,
    } else {
    }
    return
  }
  func.func @transform_0(%arg0: i32, %arg1: i32) -> (i32, i32) {
    %c0_i32 = arith.constant 0 : i32
    %c0_i32_0 = arith.constant 0 : i32
    return %arg0, %c0_i32 : i32, i32
  }
  func.func @transform_1(%arg0: i32, %arg1: i32) -> (i32, i32) {
    %c0_i32 = arith.constant 0 : i32
    %c0_i32_0 = arith.constant 0 : i32
    %c0_i32_1 = arith.constant 0 : i32
    return %c0_i32, %c0_i32_0 : i32, i32
  }
  func.func @transform_2(%arg0: i32, %arg1: i32) -> (i32, i32) {
    %c0_i32 = arith.constant 0 : i32
    %c0_i32_0 = arith.constant 0 : i32
    %c0_i32_1 = arith.constant 0 : i32
    return %c0_i32, %c0_i32_0 : i32, i32
  }
  func.func @transform_3(%arg0: i32, %arg1: i32) -> (i32, i32, i32) {
    %c0_i32 = arith.constant 0 : i32
    %c0_i32_0 = arith.constant 0 : i32
    %c0_i32_1 = arith.constant 0 : i32
    return %arg1, %c0_i32, %c0_i32_0 : i32, i32, i32
  }
  func.func @transform_4(%arg0: i32, %arg1: i32) -> (i32, i32, i32) {
    %c0_i32 = arith.constant 0 : i32
    %c0_i32_0 = arith.constant 0 : i32
    %c0_i32_1 = arith.constant 0 : i32
    return %arg1, %c0_i32, %c0_i32_0 : i32, i32, i32
  }
  func.func @transform_5(%arg0: i32, %arg1: i32) -> (i32, i32, i32) {
    %c0_i32 = arith.constant 0 : i32
    %c0_i32_0 = arith.constant 0 : i32
    %c0_i32_1 = arith.constant 0 : i32
    return %arg1, %c0_i32, %c0_i32_0 : i32, i32, i32
  }
  func.func @transform_6(%arg0: i32, %arg1: i32) -> (i32, i32, i32) {
    %c0_i32 = arith.constant 0 : i32
    %c0_i32_0 = arith.constant 0 : i32
    %c0_i32_1 = arith.constant 0 : i32
    return %arg1, %c0_i32, %c0_i32_0 : i32, i32, i32
  }
  func.func @transform_7(%arg0: i32, %arg1: i32) -> (i32, i32, i32) {
    %c0_i32 = arith.constant 0 : i32
    %c0_i32_0 = arith.constant 0 : i32
    %c0_i32_1 = arith.constant 0 : i32
    return %arg1, %c0_i32, %c0_i32_0 : i32, i32, i32
  }
  func.func @transform_8(%arg0: i32, %arg1: i32) -> (i32, i32, i32) {
    %c0_i32 = arith.constant 0 : i32
    %c0_i32_0 = arith.constant 0 : i32
    %c0_i32_1 = arith.constant 0 : i32
    return %arg1, %c0_i32, %c0_i32_0 : i32, i32, i32
  }
  func.func @transform_9(%arg0: i32, %arg1: i32) -> (i32, i32) {
    %c0_i32 = arith.constant 0 : i32
    %c0_i32_0 = arith.constant 0 : i32
    return %arg0, %c0_i32 : i32, i32
  }
}

</mosaic_0001>

<bundles_post_ra>
// kernel: tpu_custom_call.1
= control target key start
LH: loop header
LB: loop body
LE: loop exit
PB: predicated region body
PF: predicated region fallthrough
CT: control target
= control target key end

     0   :  { %s2118_s0 = inlined_call_operand.vmem [shape: f32[16,32], index: 0, kind: input, shape index: {}]   ;;  %s2119_s1 = inlined_call_operand.vmem [shape: f32[8,8], index: 1, kind: input, shape index: {}]   ;;  %s2120_s2 = inlined_call_operand.vmem [shape: f32[8,8], index: 2, kind: input, shape index: {}]   ;;  %s2121_s3 = inlined_call_operand.vmem [shape: f32[2,1,32], index: 3, kind: input, shape index: {}]   ;;  %s2122_s4 = inlined_call_operand.vmem [shape: bf16[2,32,96], index: 4, kind: input, shape index: {}]   ;;  %s2123_s5 = inlined_call_operand.vmem [shape: bf16[2,32,32], index: 5, kind: input, shape index: {}]   ;;  %s2124_s6 = inlined_call_operand.vmem [shape: f32[2,1,32], index: 6, kind: input, shape index: {}]   ;;  %s2125_s7 = inlined_call_operand.vmem [shape: bf16[2,32,256], index: 7, kind: input, shape index: {}]   ;;  %s2126_s8 = inlined_call_operand.vmem [shape: bf16[2,128,32], index: 8, kind: input, shape index: {}]   ;;  %s2127_s9 = inlined_call_operand.hbm [shape: f32[16,32], index: 9, kind: output, shape index: {}]  }
   0x1   :  { %2140 = sst [smem:[#allocation20_spill]] %s2127_s9 }
   0x2   :  { %14 = vsyncpa [#allocation8], 0 }
   0x3   :  { %16 = vsyncpa [#allocation8 + $0x1], 0  ;;  %s1798_s30 = smov 0   ;;  %s1800_s10 = smov 0  }
   0x4   :  { %s1802_s11 = smov 0   ;;  %s1804_s12 = smov 0  }
   0x5   :  { %s1806_s13 = smov 0   ;;  %s1808_s14 = smov 0  }
   0x6   :  { %s1810_s15 = smov 0   ;;  %s1812_s16 = smov 0  }
   0x7 LB: > { %2141 = sst [smem:[#allocation10_spill]] %s1701_s30  ;;  %s1365_s17 = sadd.s32 4294967295, %s1729_s16   ;;  %s1729_s16 = sphi %s1812_s16, %s22_s16   ;;  %s1725_s15 = sphi %s1810_s15, %s2165_s15   ;;  %s1721_s14 = sphi %s1808_s14, %s2168_s14   ;;  %s1717_s13 = sphi %s1806_s13, %s2163_s13   ;;  %s1713_s12 = sphi %s1804_s12, %s2162_s12   ;;  %s1709_s11 = sphi %s1802_s11, %s2161_s11   ;;  %s1705_s10 = sphi %s1800_s10, %s2167_s10   ;;  %s1701_s30 = sphi %s1798_s30, %s2166_s30  }
   0x8   : > { %2142 = sst [smem:[#allocation11_spill]] %s1709_s11  ;;  %s1366_s18 = sadd.s32 4294967294, %s1729_s16  }
   0x9   : > { %2143 = sst [smem:[#allocation12_spill]] %s1721_s14  ;;  %s31_s19 = sadd.s32 1, %s1721_s14 }
   0xa   : > { %2144 = sst [smem:[#allocation13_spill]] %s1725_s15  ;;  %p32_p0 = scmp.ge.s32.totalorder %s31_s19, 2 }
   0xb   : > { %2145 = sst [smem:[#allocation14_spill]] %s1729_s16  ;;  %s34_s20 = sadd.s32 1, %s1725_s15 }
   0xc   : > { %p275_p1 = scmp.ne.s32.totalorder %s1709_s11, %s1705_s10  ;;  %p276_p2 = scmp.eq.s32.totalorder %s1365_s17, 3 }
   0xd   : > { %s2170_s19 = smov (%p32_p0, %s31_s19), 0  ;;  %s2172_s20 = smov (!%p32_p0, %s34_s20), %s1725_s15 }
   0xe   : > { %2146 = sst [smem:[#allocation15_spill]] %s2170_s19  ;;  %p1847_p3 = por %p276_p2, %p275_p1 }
   0xf   : > { %p281_p4 = scmp.ne.s32.totalorder %s1705_s10, %s1701_s30  ;;  %p36_p5 = scmp.ge.s32.totalorder %s2172_s20, 2 }
  0x10   : > { %s2147_s21 = scalar_select %p1847_p3, 1, 0 }
  0x11   : > { %p282_p6 = scmp.eq.s32.totalorder %s1366_s18, 3  ;;  %p1369_p7 = scmp.ge.s32.totalorder %s1729_s16, 1 }
  0x12   : > { %2148 = sst [smem:[#allocation16_spill]] %s2147_s21  ;;  %p357_p8 = scmp.lt.s32.totalorder %s1729_s16, 5 }
  0x13   : > { %s2174_s20 = smov (%p36_p5, %s2172_s20), 0  ;;  %p1857_p9 = por %p282_p6, %p281_p4 }
  0x14   : > { %2149 = sst [smem:[#allocation17_spill]] %s2174_s20  ;;  %p358_p10 = pnand %p1369_p7, %p357_p8 }
  0x15   : > { %s2150_s22 = scalar_select %p1857_p9, 1, 0 }
  0x16   : > { %s262_s23 = ssub.s32 %s1725_s15, %s2174_s20  ;;  %s265_s24 = sadd.s32 1, %s1709_s11 }
  0x17   : > { %2151 = sst [smem:[#allocation18_spill]] %s2150_s22  ;;  %p263_p11 = scmp.eq.s32.totalorder %s262_s23, 0 }
  0x18   : > { %361 = sbr.rel (%p358_p10) target bundleno = 2442 (0x98a), region = 56  ;;  %s2129_s26 = sand.u32 (!%p358_p10), 1, %s1705_s10  }
  0x19   : > { %s1865_s25 = scalar_select %p263_p11, %s1709_s11, %s265_s24  }
  0x1a   : > { %p418_p12 = scmp.lt.s32.totalorder (!%p358_p10), %s1717_s13, 1  ;;  %s1871_s27 = sshll.u32 (!%p358_p10), %s2129_s26, 3 }
  0x1b   : > { %2152 = sst [smem:[#allocation19_spill]] %s1865_s25  ;;  %p422_p13 = scmp.lt.s32.totalorder (!%p358_p10), %s1713_s12, 1 }
  0x1c   : > { %s417_s30 = scalar_lea.vmem (!%p358_p10), [#allocation7], %s1871_s27  ;;  %p1380_p0 = scmp.ne.s32.totalorder (!%p358_p10), %s1713_s12, 0 }
  0x1d   : > { %s419_s28 = scalar_select %p418_p12, %s1717_s13, 1 }
  0x1e   : > { %s1876_s29 = scalar_select %p422_p13, %s1713_s12, 1 }
  0x1f   : > { %s1371_s17 = sshll.u32 %s419_s28, 3 }
  0x20   : > { %s421_s24 = scalar_lea.vmem %s2118_s0, %s1371_s17  ;;  %s1420_s15 = sshll.u32 %s1876_s29, 4 }
  0x21   : > { %s437_s11 = scalar_lea.vmem %s2124_s6, %s1876_s29  ;;  %s1893_s16 = scalar_lea.vmem %s2122_s4, %s1420_s15 }
  0x22   : > { %s1898_s21 = scalar_lea.vmem %s2123_s5, %s1420_s15  ;;  %s1422_s17 = sshll.u32 %s1876_s29, 5 }
  0x23   : > { %s1423_s18 = sshll.u32 %s1876_s29, 6  ;;  %s1905_s20 = scalar_lea.vmem %s2125_s7, %s1422_s17 }
  0x24   : > { %s1910_s25 = scalar_lea.vmem %s2126_s8, %s1423_s18  ;;  %452 = sbr.rel (%p1380_p0) target bundleno = 48 (0x30), region = 60 }
  0x29   : > { %v453_v0 = vld [vmem:[%s421_s24] sm:$0xff]  ;;  %vm454_vm0 = vcmask 261120   ;;  %v456_v1 = vlaneseq  ;;  %vm462_vm1 = vcmask 64512   ;;  %v1731_v4 = vmov 0.0  }
  0x2a   : > { %455 = vst.msk [vmem:[#allocation2] sm:$0xff] %vm454_vm0, %v453_v0 }
  0x2b   : > { %v457_v2 = vshrl.u32 %v456_v1, 7  ;;  %v459_v3 = vand.u32 127, %v456_v1 }
  0x2d   : > { %vm460_vm2 = vcmp.gt.s32.totalorder %v459_v3, %v457_v2 }
  0x2e   : > { %v461_v5 = vsel %vm460_vm2, -1e+30, %v1731_v4 }
  0x2f   : > { %463 = vst.msk [vmem:[#allocation6] sm:$0xff] %vm462_vm1, %v461_v5 }
  0x30 PF: > { %vm470_vm3 = vcmask 261120   ;;  %v1601_v9 = vld [vmem:[%s1893_s16 + $0x8] sm:$0xff]   ;;  %v1732_v10 = vmov 0.0   ;;  %vm1733_vm4 = vmmov 0   ;;  %v1602_v11 = vld [vmem:[%s1893_s16] sm:$0xff]   ;;  %s1734_s16 = smov 40   ;;  %s2153_s9 = scalar_lea.vmem %s2121_s3, %s1876_s29 }
  0x31   : > { %v1914_v6 = vld [vmem:[#allocation2] sm:$0xff]  ;;  %1454 = vmatprep.subr.bf16.mxu0 %v1732_v10  ;;  %1458 = vmatprep.mubr.msk.bf16.mxu0 %vm1733_vm4, %v1732_v10  ;;  %s1735_s24 = smov 56   ;;  %s1736_s28 = smov 8   ;;  %vm558_vm5 = vcmask 60416   ;;  %vm578_vm6 = vcmask 126016   ;;  %vm636_vm7 = vcmask 191616  }
  0x32   : > { %v469_v7 = vmul.f32 %v1914_v6, %v1914_v6  ;;  %1455 = vmatpush3.bf16.msra.mxu0 %v1601_v9  ;;  %1474 = vmatprep.subr.bf16.mxu1 %v1732_v10  ;;  %v1932_v12 = vld [vmem:[%s2119_s1] sm:$0xff]  ;;  %s1737_s17 = smov 24   ;;  %s1738_s18 = smov 32   ;;  %vm658_vm8 = vcmask 257216   ;;  %vm704_vm9 = vcmask 130048   ;;  %vm753_vm10 = vcmask 64512  }
  0x33   : > { %1456 = vmatprep.subr.bf16.mxu0 %v1732_v10  ;;  %1476 = vmatprep.mubr.msk.bf16.mxu1 %vm1733_vm4, %v1732_v10  ;;  %v1937_v13 = vld [vmem:[%s2120_s2] sm:$0xff]  ;;  %s1739_s23 = smov 48   ;;  %s1740_s15 = smov 120   ;;  %vm773_vm11 = vcmask 1043456   ;;  %vm818_vm12 = vcmask 125952   ;;  %vm947_vm13 = vcmask 257152  }
  0x34   : > { %v471_v8 = vsel %vm470_vm3, %v469_v7, 0.0  ;;  %605 = vrot.lane.b32.xlu1 %v1932_v12, %s1734_s16  ;;  %v1381_v18 = vld [vmem:[%s2153_s9] ss:$0 sm:$0xff]  ;;  %s1741_s22 = smov 16   ;;  %s1742_s26 = smov 104  }
  0x35   : > { %472 = vadd.xlane.f32.xlu0 %v471_v8  ;;  %p1415_p1 = scmp.ne.s32.totalorder %s1713_s12, 1 }
  0x36   : > { %1457 = vmatpush3.bf16.msra.mxu0 %v1602_v11 }
  0x37   : > { %1462 = vmatprep.subr.bf16.mxu0 %v1732_v10 }
  0x38   : > { %664 = vrot.lane.b32.xlu1 %v1937_v13, %s1735_s24 }
  0x3c   : > { %685 = vrot.lane.b32.xlu1 %v1932_v12, %s1735_s24  ;;  %s1744_s24 = smov 112  }
  0x40   : > { %562 = vrot.lane.b32.xlu1 %v1932_v12, %s1736_s28 }
  0x44   : > { %642 = vrot.lane.b32.xlu1 %v1932_v12, %s1737_s17 }
  0x48   : > { %580 = vrot.lane.b32.xlu1 %v1932_v12, %s1738_s18 }
  0x4b   : > { %584 = vrot.lane.b32.xlu0 %v1937_v13, %s1734_s16  ;;  %s1743_s16 = smov 96  }
  0x4c   : > { %601 = vrot.lane.b32.xlu1 %v1937_v13, %s1738_s18 }
  0x50   : > { %660 = vrot.lane.b32.xlu1 %v1932_v12, %s1739_s23 }
  0x54   : > { %681 = vrot.lane.b32.xlu1 %v1937_v13, %s1739_s23 }
  0xa6   : > { %v606_v22 = vpop.permute.xlu1 %605 }
  0xaa   : > { %v665_v23 = vpop.permute.xlu1 %664 }
  0xae   : > { %v686_v25 = vpop.permute.xlu1 %685 }
  0xb2   : > { %v563_v34 = vpop.permute.xlu1 %562 }
  0xb6   : > { %v643_v36 = vpop.permute.xlu1 %642 }
  0xba   : > { %v581_v38 = vpop.permute.xlu1 %580 }
  0xbe   : > { %v473_v14 = vpop.xlane.xlu0 %472  ;;  %v602_v39 = vpop.permute.xlu1 %601 }
  0xbf   : > { %v475_v15 = vmul.f32 0.03125, %v473_v14 }
  0xc1   : > { %v476_v16 = vadd.f32 1e-06, %v475_v15 }
  0xc2   : > { %v585_v24 = vpop.permute.xlu0 %584  ;;  %v661_v40 = vpop.permute.xlu1 %660 }
  0xc3   : > { %1621 = vrsqrt.f32 %v476_v16 }
  0xc6   : > { %v682_v41 = vpop.permute.xlu1 %681 }
  0xd0   : > { %v1622_v17 = vpop.eup %1621 }
  0xd1   : > { %v478_v19 = vmul.f32 %v1622_v17, %v1914_v6 }
  0xd3   : > { %v485_v20 = vmul.f32 %v1381_v18, %v478_v19 }
  0xd5   : > { %v486_v21 = vpack.c.bf16 %v485_v20, %v485_v20 }
  0xd7   : > { %1459 = vmatmul.mubr.msk.bf16.vlgmr.msra.gmra.mxu0 %vm470_vm3, %v486_v21 }
  0xd8   : > { %1464 = vmatprep.mubr.msk.bf16.mxu0 %vm1733_vm4, %v1732_v10 }
 0x197   : > { %v1962_v26 = vpop.f32.mrf.mxu0 }
 0x198   : > { %v587_v27 = vmul.f32 %v585_v24, %v1962_v26  ;;  %v688_v28 = vmul.f32 %v686_v25, %v1962_v26  ;;  %v608_v31 = vmul.f32 %v606_v22, %v1962_v26  ;;  %v667_v33 = vmul.f32 %v665_v23, %v1962_v26 }
 0x199   : > { %v1460_v29 = vpop.f32.mrf.mxu0  ;;  %v565_v35 = vmul.f32 %v563_v34, %v1962_v26  ;;  %v645_v37 = vmul.f32 %v643_v36, %v1962_v26  ;;  %v604_v43 = vmul.f32 %v602_v39, %v1962_v26  ;;  %v684_v46 = vmul.f32 %v682_v41, %v1962_v26  ;;  %v467_v34 = vld [vmem:[#allocation6] sm:$0xff] }
 0x19a   : > { %690 = vrot.lane.b32.xlu1 %v688_v28, %s1740_s15  ;;  %589 = vrot.lane.b32.xlu0 %v587_v27, %s1740_s15  ;;  %v583_v52 = vmul.f32 %v581_v38, %v1962_v26  ;;  %v663_v57 = vmul.f32 %v661_v40, %v1962_v26  ;;  %v560_v58 = vmul.f32 %v1962_v26, %v1937_v13 }
 0x19b   : > { %v543_v30 = vpop.f32.mrf.mxu0  ;;  %v546_v11 = vmul.f32 %v1962_v26, %v1932_v12 }
 0x19d   : > { %v1461_v32 = vpop.f32.mrf.mxu0 }
 0x19e   : > { %626 = vrot.lane.b32.xlu1 %v1937_v13, %s1737_s17  ;;  %610 = vrot.lane.b32.xlu0 %v608_v31, %s1740_s15 }
 0x1a2   : > { %638 = vrot.lane.b32.xlu1 %v1937_v13, %s1741_s22  ;;  %669 = vrot.lane.b32.xlu0 %v667_v33, %s1740_s15 }
 0x1a6   : > { %548 = vrot.lane.b32.xlu0 %v1937_v13, %s1736_s28 }
 0x1aa   : > { %567 = vrot.lane.b32.xlu0 %v565_v35, %s1740_s15 }
 0x1ae   : > { %647 = vrot.lane.b32.xlu0 %v645_v37, %s1740_s15 }
 0x20c   : > { %v590_v42 = vpop.permute.xlu0 %589  ;;  %v691_v44 = vpop.permute.xlu1 %690 }
 0x20d   : > { %v693_v48 = vadd.f32 %v691_v44, %v684_v46  ;;  %v592_v54 = vsub.f32 %v583_v52, %v590_v42 }
 0x20f   : > { %v1429_v51 = vpack.c.bf16 %v693_v48, %v693_v48  ;;  %v1425_v60 = vpack.c.bf16 %v592_v54, %v592_v54  ;;  %v766_v48 = vpack.c.bf16 %v1962_v26, %v1962_v26 }
 0x210   : > { %v611_v45 = vpop.permute.xlu0 %610  ;;  %v627_v56 = vpop.permute.xlu1 %626 }
 0x211   : > { %v613_v47 = vadd.f32 %v611_v45, %v604_v43  ;;  %v629_v4 = vmul.f32 %v627_v56, %v1962_v26 }
 0x213   : > { %v1426_v49 = vpack.c.bf16 %v613_v47, %v613_v47 }
 0x214   : > { %v670_v50 = vpop.permute.xlu0 %669  ;;  %v639_v0 = vpop.permute.xlu1 %638 }
 0x215   : > { %618 = vrot.lane.b32.xlu0 %v1426_v49, %s1742_s26  ;;  %v672_v61 = vsub.f32 %v663_v57, %v670_v50  ;;  %v641_v3 = vmul.f32 %v639_v0, %v1962_v26 }
 0x217   : > { %v1428_v1 = vpack.c.bf16 %v672_v61, %v672_v61 }
 0x218   : > { %v549_v53 = vpop.permute.xlu0 %548 }
 0x219   : > { %v551_v55 = vmul.f32 %v549_v53, %v1962_v26  ;;  %698 = vrot.lane.b32.xlu0 %v1429_v51, %s1742_s26 }
 0x21b   : > { %553 = vrot.lane.b32.xlu1 %v551_v55, %s1740_s15 }
 0x21c   : > { %v568_v59 = vpop.permute.xlu0 %567 }
 0x21d   : > { %v570_v62 = vadd.f32 %v568_v59, %v560_v58  ;;  %622 = vrot.lane.b32.xlu0 %v1932_v12, %s1741_s22 }
 0x21f   : > { %v1424_v63 = vpack.c.bf16 %v570_v62, %v570_v62  ;;  %597 = vrot.lane.b32.xlu1 %v1425_v60, %s1743_s16 }
 0x220   : > { %v648_v2 = vpop.permute.xlu0 %647 }
 0x221   : > { %575 = vrot.lane.b32.xlu0 %v1424_v63, %s1736_s28  ;;  %v650_v5 = vadd.f32 %v648_v2, %v641_v3 }
 0x223   : > { %677 = vrot.lane.b32.xlu1 %v1428_v1, %s1743_s16  ;;  %v1427_v7 = vpack.c.bf16 %v650_v5, %v650_v5 }
 0x227   : > { %631 = vrot.lane.b32.xlu1 %v629_v4, %s1740_s15 }
 0x22b   : > { %655 = vrot.lane.b32.xlu1 %v1427_v7, %s1736_s28  ;;  %s1745_s28 = smov 64  }
 0x287   : > { %v619_v8 = vpop.permute.xlu0 %618 }
 0x28b   : > { %v699_v9 = vpop.permute.xlu0 %698 }
 0x28d   : > { %v554_v13 = vpop.permute.xlu1 %553 }
 0x28e   : > { %v556_v14 = vsub.f32 %v546_v11, %v554_v13 }
 0x28f   : > { %v623_v15 = vpop.permute.xlu0 %622 }
 0x290   : > { %v557_v16 = vpack.c.bf16 %v556_v14, %v556_v14  ;;  %v625_v20 = vmul.f32 %v623_v15, %v1962_v26  ;;  %v1605_v14 = vld [vmem:[%s1898_s21 + $0x8] sm:$0xff]   ;;  %v1606_v15 = vld [vmem:[%s1898_s21] sm:$0xff]  }
 0x291   : > { %v598_v17 = vpop.permute.xlu1 %597 }
 0x292   : > { %559 = vst.msk [vmem:[#allocation3] sm:$0xf] %vm558_vm5, %v557_v16  ;;  %600 = vst.msk [vmem:[#allocation4] sm:$0xf] %vm558_vm5, %v598_v17 }
 0x293   : > { %621 = vst.msk [vmem:[#allocation4] sm:$0xf] %vm578_vm6, %v619_v8  ;;  %v576_v18 = vpop.permute.xlu0 %575 }
 0x294   : > { %579 = vst.msk [vmem:[#allocation3] sm:$0xf] %vm578_vm6, %v576_v18 }
 0x295   : > { %v678_v19 = vpop.permute.xlu1 %677 }
 0x296   : > { %680 = vst.msk [vmem:[#allocation4] sm:$0xf] %vm636_vm7, %v678_v19 }
 0x297   : > { %701 = vst.msk [vmem:[#allocation4] sm:$0xf] %vm658_vm8, %v699_v9 }
 0x299   : > { %v632_v12 = vpop.permute.xlu1 %631 }
 0x29a   : > { %v634_v21 = vsub.f32 %v625_v20, %v632_v12 }
 0x29c   : > { %v635_v22 = vpack.c.bf16 %v634_v21, %v634_v21 }
 0x29d   : > { %v656_v23 = vpop.permute.xlu1 %655 }
 0x29e   : > { %637 = vst.msk [vmem:[#allocation3] sm:$0xf] %vm636_vm7, %v635_v22  ;;  %v703_v24 = vld [vmem:[#allocation4] sm:$0xf] }
 0x29f   : > { %v1603_v25 = vld [vmem:[#allocation4] ss:$0 sps:$4 sm:$0xff]   ;;  %659 = vst.msk [vmem:[#allocation3] sm:$0xf] %vm658_vm8, %v656_v23  ;;  %v709_v27 = vsel %vm704_vm9, %v703_v24, 0 }
 0x2a0   : > { %1463 = vmatpush3.bf16.xpose.msra.mxu0 %v709_v27  ;;  %830 = vrot.lane.b32.xlu0 %v1603_v25, %s1744_s24 }
 0x2a1   : > { %1468 = vmatprep.subr.bf16.mxu0 %v1732_v10 }
 0x2a6   : > { %v702_v28 = vld [vmem:[#allocation3] sm:$0xf] }
 0x2a7   : > { %v1604_v29 = vld [vmem:[#allocation3] ss:$0 sps:$4 sm:$0xff]   ;;  %1465 = vmatmul.mubr.msk.bf16.vlgmr.msra.gmra.mxu0 %vm704_vm9, %v702_v28 }
 0x2a8   : > { %825 = vrot.lane.b32.xlu1 %v1604_v29, %s1744_s24  ;;  %1470 = vmatprep.mubr.msk.bf16.mxu0 %vm1733_vm4, %v1732_v10 }
 0x312   : > { %v831_v30 = vpop.permute.xlu0 %830 }
 0x313   : > { %v836_v31 = vsel %vm704_vm9, %v831_v30, 0  ;;  %v1607_v30 = vld [vmem:[%s1905_s20 + $0x10] ss:$8 sps:$4 sm:$0xff]  }
 0x314   : > { %1475 = vmatpush3.bf16.xpose.msra.mxu1 %v836_v31  ;;  %v1609_v31 = vld [vmem:[%s1905_s20 + $0x14] ss:$8 sps:$4 sm:$0xff]  }
 0x315   : > { %1486 = vmatprep.subr.bf16.mxu1 %v1732_v10 }
 0x31a   : > { %v826_v32 = vpop.permute.xlu1 %825 }
 0x31b   : > { %1477 = vmatmul.mubr.msk.bf16.vlgmr.msra.gmra.mxu1 %vm704_vm9, %v826_v32  ;;  %v1612_v32 = vld [vmem:[%s1905_s20 + $0x4] ss:$8 sps:$4 sm:$0xff]  }
 0x31c   : > { %1490 = vmatprep.mubr.msk.bf16.mxu1 %vm1733_vm4, %v1732_v10  ;;  %1487 = vmatpush3.bf16.msra.mxu1 %v1605_v14 }
 0x31d   : > { %1488 = vmatprep.subr.bf16.mxu1 %v1732_v10 }
 0x320   : > { %1489 = vmatpush3.bf16.msra.mxu1 %v1606_v15 }
 0x321   : > { %1494 = vmatprep.subr.bf16.mxu1 %v1732_v10 }
 0x367   : > { %v745_v33 = vpop.f32.mrf.mxu0 }
 0x368   : > { %v751_v35 = vmul.f32 0.25, %v745_v33  ;;  %v1746_v33 = vmov 0  }
 0x369   : > { %v1466_v36 = vpop.f32.mrf.mxu0 }
 0x36a   : > { %v752_v37 = vadd.f32 %v751_v35, %v467_v34 }
 0x36b   : > { %v748_v38 = vpop.f32.mrf.mxu0 }
 0x36c   : > { %v754_v39 = vsel %vm753_vm10, %v752_v37, -inf  ;;  %v1401_v38 = vld [vmem:[%s437_s11] ss:$0 sm:$0xff] }
 0x36d   : > { %755 = vmax.xlane.f32.xlu0 %v754_v39  ;;  %v1467_v40 = vpop.f32.mrf.mxu0 }
 0x3db   : > { %v872_v41 = vpop.f32.mrf.mxu1 }
 0x3dc   : > { %v878_v42 = vmul.f32 0.25, %v872_v41 }
 0x3dd   : > { %v1478_v43 = vpop.f32.mrf.mxu1 }
 0x3de   : > { %v879_v44 = vadd.f32 %v878_v42, %v467_v34  ;;  %v1613_v42 = vld [vmem:[%s1910_s25 + $0x38] sm:$0xff]   ;;  %v1614_v43 = vld [vmem:[%s1910_s25 + $0x30] sm:$0xff]  }
 0x3df   : > { %v875_v45 = vpop.f32.mrf.mxu1 }
 0x3e0   : > { %v880_v46 = vsel %vm753_vm10, %v879_v44, -inf  ;;  %v1616_v45 = vld [vmem:[%s1910_s25 + $0x20] sm:$0xff]  }
 0x3e1   : > { %881 = vmax.xlane.f32.xlu1 %v880_v46  ;;  %v1479_v47 = vpop.f32.mrf.mxu1  ;;  %v1617_v46 = vld [vmem:[%s1910_s25 + $0x18] sm:$0xff]  }
 0x3e2   : > { %v1618_v47 = vld [vmem:[%s1910_s25 + $0x10] sm:$0xff]  }
 0x3f2   : > { %768 = vrot.lane.b32.xlu1 %v766_v48, %s1745_s28 }
 0x3f6   : > { %v756_v49 = vpop.xlane.xlu0 %755 }
 0x3f7   : > { %v757_v50 = vsub.f32 %v752_v37, %v756_v49  ;;  %v1620_v49 = vld [vmem:[%s1910_s25] sm:$0xff]  }
 0x3f9   : > { %v758_v51 = vmul.f32 1.442695, %v757_v50 }
 0x3fb   : > { %1623 = vpow2.f32 %v758_v51 }
 0x408   : > { %v1624_v52 = vpop.eup %1623 }
 0x409   : > { %v760_v53 = vsel %vm753_vm10, %v1624_v52, 0.0 }
 0x40a   : > { %761 = vadd.xlane.f32.xlu0 %v760_v53 }
 0x46a   : > { %v882_v54 = vpop.xlane.xlu1 %881 }
 0x46b   : > { %v883_v55 = vsub.f32 %v879_v44, %v882_v54  ;;  %v1615_v44 = vld [vmem:[%s1910_s25 + $0x28] sm:$0xff]  }
 0x46d   : > { %v884_v56 = vmul.f32 1.442695, %v883_v55 }
 0x46e   : > { %v769_v57 = vpop.permute.xlu1 %768 }
 0x46f   : > { %1625 = vpow2.f32 %v884_v56  ;;  %v775_v58 = vsel %vm773_vm11, %v769_v57, 0 }
 0x470   : > { %1469 = vmatpush3.bf16.msra.mxu0 %v775_v58 }
 0x471   : > { %1480 = vmatprep.subr.bf16.mxu0 %v1732_v10 }
 0x47c   : > { %v1626_v26 = vpop.eup %1625 }
 0x47d   : > { %v886_v59 = vsel %vm753_vm10, %v1626_v26, 0.0 }
 0x47e   : > { %887 = vadd.xlane.f32.xlu0 %v886_v59 }
 0x493   : > { %v762_v60 = vpop.xlane.xlu0 %761 }
 0x494   : > { %1627 = vrcp.f32 %v762_v60  ;;  %892 = vrot.lane.b32.xlu0 %v766_v48, %s1739_s23  ;;  %v1619_v48 = vld [vmem:[%s1910_s25 + $0x8] sm:$0xff]  }
 0x4a1   : > { %v1628_v61 = vpop.eup %1627 }
 0x4a2   : > { %v764_v62 = vmul.f32 %v1628_v61, %v1624_v52 }
 0x4a4   : > { %v765_v63 = vpack.c.bf16 %v764_v62, %v764_v62 }
 0x4a6   : > { %1471 = vmatmul.mubr.msk.bf16.vlgmr.msra.gmra.mxu0 %vm753_vm10, %v765_v63 }
 0x4a7   : > { %1482 = vmatprep.mubr.msk.bf16.mxu0 %vm1733_vm4, %v1732_v10 }
 0x507   : > { %v888_v0 = vpop.xlane.xlu0 %887 }
 0x508   : > { %1629 = vrcp.f32 %v888_v0 }
 0x50b   : > { %v893_v1 = vpop.permute.xlu0 %892 }
 0x50c   : > { %v898_v2 = vsel %vm773_vm11, %v893_v1, 0 }
 0x50d   : > { %1481 = vmatpush3.bf16.msra.mxu0 %v898_v2 }
 0x50e   : > { %1066 = vmatprep.subr.bf16.mxu0 %v1609_v31 }
 0x515   : > { %v1630_v3 = vpop.eup %1629 }
 0x516   : > { %v890_v4 = vmul.f32 %v1630_v3, %v1626_v26 }
 0x518   : > { %v891_v5 = vpack.c.bf16 %v890_v4, %v890_v4 }
 0x51a   : > { %1483 = vmatmul.mubr.msk.bf16.vlgmr.msra.gmra.mxu0 %vm753_vm10, %v891_v5 }
 0x51b   : > { %1086 = vmatprep.mubr.bf16.mxu0 %v1746_v33  ;;  %1067 = vmatpush1.bf16.msra.mxu0 %v1607_v30 }
 0x51c   : > { %1068 = vmatprep.subr.bf16.mxu0 %v1612_v32 }
 0x566   : > { %v811_v7 = vpop.f32.mrf.mxu0 }
 0x567   : > { %v817_v8 = vpack.c.bf16 %v811_v7, %v811_v7 }
 0x568   : > { %v1472_v9 = vpop.f32.mrf.mxu0 }
 0x569   : > { %819 = vst.msk [vmem:[#allocation5] sm:$0xf] %vm818_vm12, %v817_v8 }
 0x56a   : > { %v814_v11 = vpop.f32.mrf.mxu0 }
 0x56c   : > { %v1473_v13 = vpop.f32.mrf.mxu0 }
 0x5da   : > { %v934_v16 = vpop.f32.mrf.mxu0 }
 0x5db   : > { %v1430_v17 = vpack.c.bf16 %v934_v16, %v934_v16 }
 0x5dc   : > { %v1484_v18 = vpop.f32.mrf.mxu0 }
 0x5dd   : > { %944 = vrot.lane.b32.xlu1 %v1430_v17, %s1741_s22 }
 0x5de   : > { %v937_v19 = vpop.f32.mrf.mxu0 }
 0x5e0   : > { %v1485_v20 = vpop.f32.mrf.mxu0 }
 0x64f   : > { %v945_v12 = vpop.permute.xlu1 %944 }
 0x650   : > { %948 = vst.msk [vmem:[#allocation5] sm:$0xf] %vm947_vm13, %v945_v12 }
 0x657   : > { %v949_v21 = vld [vmem:[#allocation5] sm:$0xf] }
 0x658   : > { %1491 = vmatmul.mubr.msk.bf16.vlgmr.msra.gmra.mxu1 %vm470_vm3, %v949_v21 }
 0x659   : > { %1510 = vmatprep.mubr.msk.bf16.mxu1 %vm1733_vm4, %v1732_v10  ;;  %1495 = vmatpush3.bf16.msra.mxu1 %v1613_v42 }
 0x65a   : > { %1496 = vmatprep.subr.bf16.mxu1 %v1732_v10 }
 0x65d   : > { %1497 = vmatpush3.bf16.msra.mxu1 %v1614_v43 }
 0x65e   : > { %1498 = vmatprep.subr.bf16.mxu1 %v1732_v10 }
 0x661   : > { %1499 = vmatpush3.bf16.msra.mxu1 %v1615_v44 }
 0x662   : > { %1500 = vmatprep.subr.bf16.mxu1 %v1732_v10 }
 0x665   : > { %1501 = vmatpush3.bf16.msra.mxu1 %v1616_v45 }
 0x666   : > { %1502 = vmatprep.subr.bf16.mxu1 %v1732_v10 }
 0x669   : > { %1503 = vmatpush3.bf16.msra.mxu1 %v1617_v46 }
 0x66a   : > { %1504 = vmatprep.subr.bf16.mxu1 %v1732_v10 }
 0x66d   : > { %1505 = vmatpush3.bf16.msra.mxu1 %v1618_v47 }
 0x66e   : > { %1506 = vmatprep.subr.bf16.mxu1 %v1732_v10 }
 0x671   : > { %1507 = vmatpush3.bf16.msra.mxu1 %v1619_v48 }
 0x672   : > { %1508 = vmatprep.subr.bf16.mxu1 %v1732_v10 }
 0x675   : > { %1509 = vmatpush3.bf16.msra.mxu1 %v1620_v49 }
 0x718   : > { %v1003_v22 = vpop.f32.mrf.mxu1 }
 0x719   : > { %v2033_v23 = vadd.f32 %v1003_v22, %v1914_v6  ;;  %v1610_v6 = vld [vmem:[%s1905_s20] ss:$8 sps:$4 sm:$0xff]  }
 0x71a   : > { %v1492_v24 = vpop.f32.mrf.mxu1  ;;  %1069 = vmatpush1.bf16.msra.mxu0 %v1610_v6 }
 0x71b   : > { %v1011_v25 = vmul.f32 %v2033_v23, %v2033_v23 }
 0x71c   : > { %v1006_v27 = vpop.f32.mrf.mxu1 }
 0x71d   : > { %v1012_v28 = vsel %vm470_vm3, %v1011_v25, 0.0 }
 0x71e   : > { %1013 = vadd.xlane.f32.xlu1 %v1012_v28  ;;  %v1493_v29 = vpop.f32.mrf.mxu1 }
 0x7a7   : > { %v1014_v34 = vpop.xlane.xlu1 %1013 }
 0x7a8   : > { %v1015_v35 = vmul.f32 0.03125, %v1014_v34 }
 0x7aa   : > { %v1016_v36 = vadd.f32 1e-06, %v1015_v35 }
 0x7ac   : > { %1631 = vrsqrt.f32 %v1016_v36 }
 0x7b9   : > { %v1632_v37 = vpop.eup %1631 }
 0x7ba   : > { %v1018_v39 = vmul.f32 %v1632_v37, %v2033_v23 }
 0x7bc   : > { %v1025_v40 = vmul.f32 %v1401_v38, %v1018_v39 }
 0x7be   : > { %v1026_v41 = vpack.c.bf16 %v1025_v40, %v1025_v40 }
 0x7c0   : > { %1406 = vmatmul.mubr.msk.bf16.vlgmr.msra.gmra.mxu0 %vm470_vm3, %v1026_v41 }
 0x880   : > { %v1088_v50 = vpop.f32.mrf.mxu0 }
 0x881   : > { %v1095_v51 = vsub.f32 0.0, %v1088_v50 }
 0x882   : > { %v1090_v52 = vpop.f32.mrf.mxu0 }
 0x883   : > { %v1096_v53 = vmul.f32 1.442695, %v1095_v51 }
 0x884   : > { %v1092_v54 = vpop.f32.mrf.mxu0 }
 0x885   : > { %1633 = vpow2.f32 %v1096_v53 }
 0x886   : > { %v1093_v55 = vpop.f32.mrf.mxu0 }
 0x892   : > { %v1634_v56 = vpop.eup %1633 }
 0x893   : > { %v1098_v57 = vadd.f32 1.0, %v1634_v56 }
 0x895   : > { %1635 = vrcp.f32 %v1098_v57 }
 0x8a2   : > { %v1636_v58 = vpop.eup %1635 }
 0x8a3   : > { %v1101_v26 = vmul.f32 %v1636_v58, %v1088_v50 }
 0x8a5   : > { %v1102_v59 = vmul.f32 %v1101_v26, %v1090_v52 }
 0x8a7   : > { %v1103_v60 = vpack.c.bf16 %v1102_v59, %v1102_v59 }
 0x8a9   : > { %1511 = vmatmul.mubr.bf16.vlgmr.msra.gmra.mxu1 %v1103_v60 }
 0x969   : > { %v1202_v61 = vpop.f32.mrf.mxu1 }
 0x96a   : > { %v1208_v10 = vadd.f32 %v1202_v61, %v2033_v23 }
 0x96b   : > { %v1512_v62 = vpop.f32.mrf.mxu1  ;;  %1213 = sbr.rel (%p1415_p1) target bundleno = 2417 (0x971), region = 64 }
 0x96c   : > { %1209 = vst.msk [vmem:[#allocation2] sm:$0xff] %vm470_vm3, %v1208_v10 }
 0x96d   : > { %v1205_v63 = vpop.f32.mrf.mxu1 }
 0x96f   : > { %v1513_v0 = vpop.f32.mrf.mxu1 }
 0x970   : > { %1214 = vst.msk [vmem:[%s417_s30] sm:$0xff] %vm470_vm3, %v1208_v10 }
 0x971 PF: > { %s1417_s29 = sshll.u32 %s1717_s13, 7  ;;  %s2155_s18 = sld [smem:[#allocation20_spill]] }
 0x972   : > { %s1229_s19 = sshll.u32 %s417_s30, 4  ;;  %s2156_s14 = sand.u32 1, %s1705_s10   ;;  %s1230_s19 = int_to_ptr.vmem [resolvable:$true] %s1229_s19 }
 0x973   : > { %s1216_s12 = scalar_lea.sflag [#allocation8], %s2156_s14  ;;  %s1637_s9 = scalar_lea.vmem %s1230_s19, 128 }
 0x974   : > { %p1638_p2 = scmp.ne.s32.totalorder %s1230_s19, %s1637_s9  ;;  %s1747_s15 = smov [#allocation7]  }
 0x975   : > { %s1641_s22 = sshll.u32 %s1747_s15, 4  ;;  %s1642_s22 = int_to_ptr.vmem [resolvable:$false] %s1641_s22 }
 0x976   : > { %p1639_p4 = pnand %p1638_p2, %p1847_p3  ;;  %s1643_s26 = scalar_lea.vmem %s1642_s22, 256 }
 0x977   : > { %s1227_s23 = scalar_lea.hbm %s2155_s18, %s1417_s29  ;;  %p1644_p6 = scmp.lt.s32.totalorder %s1230_s19, %s1642_s22 }
 0x978   : > { %p1640_p5 = pneg %p1639_p4  ;;  %p1645_p7 = scmp.lt.s32.totalorder %s1643_s26, %s1637_s9 }
 0x97a   : > { %p1646_p8 = por %p1645_p7, %p1644_p6 }
 0x97c   : > { %p1647_p10 = pnand %p1646_p8, %p1640_p5 }
 0x97e   : > { %1650 = shalt.err (!%p1647_p10)
}
 0x97f   : > { %s1651_s13 = scalar_lea.hbm %s1227_s23, 128  ;;  %s1655_s16 = scalar_lea.hbm %s2155_s18, 256 }
 0x980   : > { %p1652_p11 = scmp.ne.s32.totalorder %s1227_s23, %s1651_s13  ;;  %p1656_p0 = scmp.lt.s32.totalorder %s1227_s23, %s2155_s18 }
 0x981   : > { %p1657_p1 = scmp.lt.s32.totalorder %s1655_s16, %s1651_s13 }
 0x982   : > { %p1653_p12 = pnand %p1652_p11, %p1847_p3 }
 0x983   : > { %p1658_p2 = por %p1657_p1, %p1656_p0 }
 0x984   : > { %p1654_p13 = pneg %p1653_p12 }
 0x986   : > { %p1659_p4 = pnand %p1658_p2, %p1654_p13 }
 0x988   : > { %1662 = shalt.err (!%p1659_p4)
}
 0x989   : > { %1514 = dma.vmem_to_hbm [thread:$0]  (%p1847_p3), %s1230_s19, 128, %s1227_s23, %s1216_s12  }
 0x98a PF: > { %s2157_s21 = sld [smem:[#allocation14_spill]] }
 0x98b   : > { %s2158_s17 = sld [smem:[#allocation10_spill]] }
 0x990   : > { %p1520_p5 = scmp.ge.s32.totalorder %s2157_s21, 2 }
 0x991   : > { %s1241_s20 = sand.u32 1, %s2158_s17  }
 0x992   : > { %p1517_p6 = pnand %p1520_p5, %p1857_p9  ;;  %s1242_s25 = scalar_lea.sflag [#allocation8], %s1241_s20 }
 0x994   : > { %p1518_p7 = pneg %p1517_p6 }
 0x996   : > { %1696 = dma.done.wait (%p1518_p7), %s1242_s25, 128  }
 0x997   : > { %1698 = vsyncadd (%p1518_p7), %s1242_s25, 4294967168  ;;  %s22_s16 = sadd.s32 1, %s2157_s21   ;;  %s2160_s14 = sld [smem:[#allocation11_spill]] }
 0x998   : > { %p19_p8 = scmp.ge.s32.totalorder %s22_s16, 6   ;;  %s2161_s11 = sld [smem:[#allocation19_spill]] }
 0x999   : > { %s2162_s12 = sld [smem:[#allocation12_spill]]  ;;  %s2166_s30 = smov %s1705_s10 }
 0x99a   : > { %s2163_s13 = sld [smem:[#allocation13_spill]] }
 0x99b   : > { %s2164_s23 = sld [smem:[#allocation15_spill]] }
 0x99c   : > { %s2165_s15 = sld [smem:[#allocation17_spill]] }
 0x99d   : > { %s2167_s10 = smov %s2160_s14  ;;  %21 = sbr.rel (!%p19_p8) target bundleno = 7 (0x7), region = 117 }
 0x9a1   : > { %s2168_s14 = smov %s2164_s23 }
 0x9a2   :  { %1247 = vsyncpa [#allocation8], 1 }
 0x9a3   :  { %1249 = vsyncpa [#allocation8 + $0x1], 1 }

</bundles_post_ra>
